<compile_context>
chip_gen: v7x
topology: tpu7x:2x2x1
jax: 0.10.0
libtpu: 0.0.40
codegen_flags: <defaults>
</compile_context>

<pallas_src>
import jax
import jax.numpy as jnp
from jax.experimental import pallas as pl
from jax.experimental.pallas import tpu as pltpu

L_IN = 256                        # input sequence length (NCL with C == 1)
K = 5                             # all three Conv1d kernels have size 5
N_CONV = 3
L_CONV = L_IN - N_CONV * (K - 1)  # 244, matches nn.Linear(244, 256)
H = 256                           # fc1 out / fc2 hidden (num_hidden=256)


def _shift_left(v, j):
    """Lane shift-left by j with wrap: out[:, i] = v[:, (i + j) % L]."""
    if j == 0:
        return v
    return jnp.concatenate([v[:, j:], v[:, :j]], axis=1)


def cnn1_kernel(x_ref, wconv_ref, bconv_ref,
                w1_ref, b1_ref,
                w2a_ref, b2a_ref,
                w2b_ref, b2b_ref,
                w2c_ref, b2c_ref,
                out_ref):
    # Hoist all SMEM scalar reads ahead of the vector work (scalar-slot hygiene;
    # also keeps them ahead of any pipeline DMA waits).
    taps = [[wconv_ref[c, j] for j in range(K)] for c in range(N_CONV)]
    biases = [bconv_ref[c] for c in range(N_CONV)]

    h = x_ref[...]                                    # (TB, 256) f32 in VMEM

    # --- classifier: 3 x (Conv1d(1,1,5) + ReLU), full 256-lane width ---
    # acc[:, i] = sum_j w[c, j] * h[:, i + j]  (cross-correlation).
    # Lanes past the valid length pick up wrap-around garbage that never feeds
    # a valid lane of the next conv and is killed by the zero-padded fc1 rows.
    for c in range(N_CONV):
        acc = taps[c][0] * h
        for j in range(1, K):
            acc = acc + taps[c][j] * _shift_left(h, j)
        h = jnp.maximum(acc + biases[c], 0.0)          # (TB, 256) f32

    # --- fc1: Linear(244, 256) + ReLU (+ Dropout(0.5)) ---
    # w1 is zero-padded to (256, 256); rows 244..255 are exactly zero, so the
    # garbage tail lanes of h contribute nothing.  bf16 operands, f32 accumulate.
    h = jnp.dot(h.astype(jnp.bfloat16), w1_ref[...],
                preferred_element_type=jnp.float32) + b1_ref[...]
    h = jnp.maximum(h, 0.0)
    # TODO(synk): Dropout(0.5) is identity here (inference mode); training-mode
    # random masking is not implemented.

    # --- fc2: Linear+ReLU, Linear+ReLU, Linear -> 1 ---
    h = jnp.dot(h.astype(jnp.bfloat16), w2a_ref[...],
                preferred_element_type=jnp.float32) + b2a_ref[...]
    h = jnp.maximum(h, 0.0)
    h = jnp.dot(h.astype(jnp.bfloat16), w2b_ref[...],
                preferred_element_type=jnp.float32) + b2b_ref[...]
    h = jnp.maximum(h, 0.0)

    # Final Linear(256, 1): multiply + lane reduction on the VPU/XLU instead of
    # an N=1 MXU pass (which would waste a full systolic pass for one column).
    out_ref[...] = jnp.sum(h * w2c_ref[...], axis=-1, keepdims=True) + b2c_ref[...]


def init_params(key):
    """Deterministic synthetic parameters (PyTorch weight shapes, pre-transposed)."""
    ks = jax.random.split(key, 10)
    s = 0.05
    wconv = jax.random.normal(ks[0], (N_CONV, K), jnp.float32) * s   # 3 x Conv1d(1,1,5)
    bconv = jax.random.normal(ks[1], (N_CONV,), jnp.float32) * s
    w1 = jax.random.normal(ks[2], (L_CONV, H), jnp.float32) * s      # Linear(244,256).W^T
    b1 = jax.random.normal(ks[3], (1, H), jnp.float32) * s
    w2a = jax.random.normal(ks[4], (H, H), jnp.float32) * s          # Linear(256,256).W^T
    b2a = jax.random.normal(ks[5], (1, H), jnp.float32) * s
    w2b = jax.random.normal(ks[6], (H, H), jnp.float32) * s          # Linear(256,256).W^T
    b2b = jax.random.normal(ks[7], (1, H), jnp.float32) * s
    w2c = jax.random.normal(ks[8], (H, 1), jnp.float32) * s          # Linear(256,1).W^T
    b2c = jax.random.normal(ks[9], (1, 1), jnp.float32) * s
    return (wconv, bconv, w1, b1, w2a, b2a, w2b, b2b, w2c, b2c)


def _round_up(n, m):
    return ((n + m - 1) // m) * m


def cnn1_forward(x, params, *, block_b=None):
    """x: (B, 1, L_IN) float32 (NCL).  Returns (B, 1, 1) float32."""
    wconv, bconv, w1, b1, w2a, b2a, w2b, b2b, w2c, b2c = params
    B = x.shape[0]
    assert x.shape[1:] == (1, L_IN), f"CNN1_Net requires (B, 1, {L_IN}) input, got {x.shape}"
    assert w1.shape == (L_CONV, H) and w2a.shape == (H, H), "fc1 out must equal fc2 hidden (=256)"

    x2d = x.reshape(B, L_IN)                          # squeeze channel dim of size 1

    # Batch tile: multiple of 8 (f32 sublane), up to 256 rows (full MXU LHS tile
    # on v6e/v7x); tile footprint ~1 MiB so scoped VMEM limits are never hit.
    if block_b is None:
        block_b = min(256, _round_up(max(B, 1), 8))
    block_b = max(8, _round_up(block_b, 8))
    B_pad = _round_up(B, block_b)
    if B_pad != B:
        x2d = jnp.pad(x2d, ((0, B_pad - B), (0, 0)))
    nb = B_pad // block_b

    # Weight prep: zero-pad fc1 to a clean 256-long contraction (rows 244..255
    # exactly zero), bf16 for the MXU matmuls (f32 accumulate in-kernel).
    w1_p = jnp.pad(w1, ((0, L_IN - L_CONV), (0, 0))).astype(jnp.bfloat16)   # (256, 256)
    w2a_b = w2a.astype(jnp.bfloat16)
    w2b_b = w2b.astype(jnp.bfloat16)
    w2c_row = w2c.reshape(1, H)                       # f32 row for the VPU reduce

    smem = pl.BlockSpec(memory_space=pltpu.MemorySpace.SMEM)  # untiled, whole array
    const2 = lambda i: (0, 0)                                  # VMEM-resident weights

    out2d = pl.pallas_call(
        cnn1_kernel,
        out_shape=jax.ShapeDtypeStruct((B_pad, 1), jnp.float32),
        grid=(nb,),
        in_specs=[
            pl.BlockSpec((block_b, L_IN), lambda i: (i, 0)),   # x tile
            smem, smem,                                        # conv taps / biases
            pl.BlockSpec((L_IN, H), const2),                   # fc1 W (padded, bf16)
            pl.BlockSpec((1, H), const2),                      # fc1 b
            pl.BlockSpec((H, H), const2),                      # fc2a W (bf16)
            pl.BlockSpec((1, H), const2),                      # fc2a b
            pl.BlockSpec((H, H), const2),                      # fc2b W (bf16)
            pl.BlockSpec((1, H), const2),                      # fc2b b
            pl.BlockSpec((1, H), const2),                      # fc2c W as a 256-lane row
            pl.BlockSpec((1, 1), const2),                      # fc2c b
        ],
        out_specs=pl.BlockSpec((block_b, 1), lambda i: (i, 0)),
        compiler_params=pltpu.CompilerParams(
            dimension_semantics=("parallel",)),
    )(x2d, wconv, bconv, w1_p, b1, w2a_b, b2a, w2b_b, b2b, w2c_row, b2c)

    return out2d[:B].reshape(B, 1, 1)


def reference_forward(x, params):
    """Pure-JAX f32 reference matching the PyTorch forward (eval mode)."""
    wconv, bconv, w1, b1, w2a, b2a, w2b, b2b, w2c, b2c = params
    B = x.shape[0]
    h = x.reshape(B, L_IN)
    for c in range(N_CONV):
        lout = h.shape[1] - (K - 1)
        cols = jnp.stack([h[:, j:j + lout] for j in range(K)], axis=-1)  # (B,lout,K)
        h = jax.nn.relu(jnp.einsum("blk,k->bl", cols, wconv[c]) + bconv[c])
    h = jax.nn.relu(h @ w1 + b1)
    h = jax.nn.relu(h @ w2a + b2a)
    h = jax.nn.relu(h @ w2b + b2b)
    return (h @ w2c + b2c).reshape(B, 1, 1)


if __name__ == "__main__":
    key = jax.random.PRNGKey(0)
    k_x, k_p = jax.random.split(key)
    B = 2
    x = jax.random.normal(k_x, (B, 1, L_IN), jnp.float32)
    params = init_params(k_p)

    out = cnn1_forward(x, params)
    out = jax.block_until_ready(out)

    ref = reference_forward(x, params)
    assert out.shape == (B, 1, 1), out.shape
    # Kernel uses bf16 MXU matmuls (f32 accumulate); convs/biases/reduce in f32.
    assert jnp.allclose(out, ref, rtol=1e-2, atol=5e-3), (out, ref)

    print("KERNEL_OK")
</pallas_src>

<mosaic_0001>
module attributes {stable_mosaic.version = 11 : i64} {
  func.func @cnn1_kernel(%arg0: i32, %arg1: memref<8x256xf32, #tpu.memory_space<vmem>>, %arg2: memref<3x5xf32, #tpu.memory_space<smem>>, %arg3: memref<3xf32, #tpu.memory_space<smem>>, %arg4: memref<256x256xbf16, #tpu.memory_space<vmem>>, %arg5: memref<1x256xf32, #tpu.memory_space<vmem>>, %arg6: memref<256x256xbf16, #tpu.memory_space<vmem>>, %arg7: memref<1x256xf32, #tpu.memory_space<vmem>>, %arg8: memref<256x256xbf16, #tpu.memory_space<vmem>>, %arg9: memref<1x256xf32, #tpu.memory_space<vmem>>, %arg10: memref<1x256xf32, #tpu.memory_space<vmem>>, %arg11: memref<1x1xf32, #tpu.memory_space<vmem>>, %arg12: memref<8x1xf32, #tpu.memory_space<vmem>>) attributes {dimension_semantics = [#tpu.dimension_semantics<parallel>], iteration_bounds = array<i64: 1>, scalar_prefetch = 0 : i64, scratch_operands = 0 : i64, tpu.core_type = #tpu.core_type<tc>, window_params = [{transform_indices = @transform_0, window_bounds = array<i64: 8, 256>}, {transform_indices = @transform_1, window_bounds = array<i64: 3, 5>}, {transform_indices = @transform_2, window_bounds = array<i64: 3>}, {pipeline_mode = #tpu.pipeline_mode<synchronous>, transform_indices = @transform_3, window_bounds = array<i64: 256, 256>}, {pipeline_mode = #tpu.pipeline_mode<synchronous>, transform_indices = @transform_4, window_bounds = array<i64: 1, 256>}, {pipeline_mode = #tpu.pipeline_mode<synchronous>, transform_indices = @transform_5, window_bounds = array<i64: 256, 256>}, {pipeline_mode = #tpu.pipeline_mode<synchronous>, transform_indices = @transform_6, window_bounds = array<i64: 1, 256>}, {pipeline_mode = #tpu.pipeline_mode<synchronous>, transform_indices = @transform_7, window_bounds = array<i64: 256, 256>}, {pipeline_mode = #tpu.pipeline_mode<synchronous>, transform_indices = @transform_8, window_bounds = array<i64: 1, 256>}, {pipeline_mode = #tpu.pipeline_mode<synchronous>, transform_indices = @transform_9, window_bounds = array<i64: 1, 256>}, {pipeline_mode = #tpu.pipeline_mode<synchronous>, transform_indices = @transform_10, window_bounds = array<i64: 1, 1>}, {transform_indices = @transform_11, window_bounds = array<i64: 8, 1>}]} {
    %c0 = arith.constant 0 : index
    %c0_0 = arith.constant 0 : index
    %0 = memref.load %arg2[%c0, %c0_0] : memref<3x5xf32, #tpu.memory_space<smem>>
    %c0_1 = arith.constant 0 : index
    %c1 = arith.constant 1 : index
    %1 = memref.load %arg2[%c0_1, %c1] : memref<3x5xf32, #tpu.memory_space<smem>>
    %c0_2 = arith.constant 0 : index
    %c2 = arith.constant 2 : index
    %2 = memref.load %arg2[%c0_2, %c2] : memref<3x5xf32, #tpu.memory_space<smem>>
    %c0_3 = arith.constant 0 : index
    %c3 = arith.constant 3 : index
    %3 = memref.load %arg2[%c0_3, %c3] : memref<3x5xf32, #tpu.memory_space<smem>>
    %c0_4 = arith.constant 0 : index
    %c4 = arith.constant 4 : index
    %4 = memref.load %arg2[%c0_4, %c4] : memref<3x5xf32, #tpu.memory_space<smem>>
    %c1_5 = arith.constant 1 : index
    %c0_6 = arith.constant 0 : index
    %5 = memref.load %arg2[%c1_5, %c0_6] : memref<3x5xf32, #tpu.memory_space<smem>>
    %c1_7 = arith.constant 1 : index
    %c1_8 = arith.constant 1 : index
    %6 = memref.load %arg2[%c1_7, %c1_8] : memref<3x5xf32, #tpu.memory_space<smem>>
    %c1_9 = arith.constant 1 : index
    %c2_10 = arith.constant 2 : index
    %7 = memref.load %arg2[%c1_9, %c2_10] : memref<3x5xf32, #tpu.memory_space<smem>>
    %c1_11 = arith.constant 1 : index
    %c3_12 = arith.constant 3 : index
    %8 = memref.load %arg2[%c1_11, %c3_12] : memref<3x5xf32, #tpu.memory_space<smem>>
    %c1_13 = arith.constant 1 : index
    %c4_14 = arith.constant 4 : index
    %9 = memref.load %arg2[%c1_13, %c4_14] : memref<3x5xf32, #tpu.memory_space<smem>>
    %c2_15 = arith.constant 2 : index
    %c0_16 = arith.constant 0 : index
    %10 = memref.load %arg2[%c2_15, %c0_16] : memref<3x5xf32, #tpu.memory_space<smem>>
    %c2_17 = arith.constant 2 : index
    %c1_18 = arith.constant 1 : index
    %11 = memref.load %arg2[%c2_17, %c1_18] : memref<3x5xf32, #tpu.memory_space<smem>>
    %c2_19 = arith.constant 2 : index
    %c2_20 = arith.constant 2 : index
    %12 = memref.load %arg2[%c2_19, %c2_20] : memref<3x5xf32, #tpu.memory_space<smem>>
    %c2_21 = arith.constant 2 : index
    %c3_22 = arith.constant 3 : index
    %13 = memref.load %arg2[%c2_21, %c3_22] : memref<3x5xf32, #tpu.memory_space<smem>>
    %c2_23 = arith.constant 2 : index
    %c4_24 = arith.constant 4 : index
    %14 = memref.load %arg2[%c2_23, %c4_24] : memref<3x5xf32, #tpu.memory_space<smem>>
    %c0_25 = arith.constant 0 : index
    %15 = memref.load %arg3[%c0_25] : memref<3xf32, #tpu.memory_space<smem>>
    %c1_26 = arith.constant 1 : index
    %16 = memref.load %arg3[%c1_26] : memref<3xf32, #tpu.memory_space<smem>>
    %c2_27 = arith.constant 2 : index
    %17 = memref.load %arg3[%c2_27] : memref<3xf32, #tpu.memory_space<smem>>
    %c0_28 = arith.constant 0 : index
    %c0_29 = arith.constant 0 : index
    %18 = vector.load %arg1[%c0_28, %c0_29] : memref<8x256xf32, #tpu.memory_space<vmem>>, vector<8x256xf32>
    %19 = vector.broadcast %0 : f32 to vector<8x256xf32>
    %20 = arith.mulf %19, %18 : vector<8x256xf32>
    %21 = vector.extract_strided_slice %18 {offsets = [0, 1], sizes = [8, 255], strides = [1, 1]} : vector<8x256xf32> to vector<8x255xf32>
    %22 = vector.extract_strided_slice %18 {offsets = [0, 0], sizes = [8, 1], strides = [1, 1]} : vector<8x256xf32> to vector<8x1xf32>
    %23 = tpu.concatenate %21, %22 in 1 : vector<8x255xf32>, vector<8x1xf32> -> vector<8x256xf32>
    %24 = vector.broadcast %1 : f32 to vector<8x256xf32>
    %25 = arith.mulf %24, %23 : vector<8x256xf32>
    %26 = arith.addf %20, %25 : vector<8x256xf32>
    %27 = vector.extract_strided_slice %18 {offsets = [0, 2], sizes = [8, 254], strides = [1, 1]} : vector<8x256xf32> to vector<8x254xf32>
    %28 = vector.extract_strided_slice %18 {offsets = [0, 0], sizes = [8, 2], strides = [1, 1]} : vector<8x256xf32> to vector<8x2xf32>
    %29 = tpu.concatenate %27, %28 in 1 : vector<8x254xf32>, vector<8x2xf32> -> vector<8x256xf32>
    %30 = vector.broadcast %2 : f32 to vector<8x256xf32>
    %31 = arith.mulf %30, %29 : vector<8x256xf32>
    %32 = arith.addf %26, %31 : vector<8x256xf32>
    %33 = vector.extract_strided_slice %18 {offsets = [0, 3], sizes = [8, 253], strides = [1, 1]} : vector<8x256xf32> to vector<8x253xf32>
    %34 = vector.extract_strided_slice %18 {offsets = [0, 0], sizes = [8, 3], strides = [1, 1]} : vector<8x256xf32> to vector<8x3xf32>
    %35 = tpu.concatenate %33, %34 in 1 : vector<8x253xf32>, vector<8x3xf32> -> vector<8x256xf32>
    %36 = vector.broadcast %3 : f32 to vector<8x256xf32>
    %37 = arith.mulf %36, %35 : vector<8x256xf32>
    %38 = arith.addf %32, %37 : vector<8x256xf32>
    %39 = vector.extract_strided_slice %18 {offsets = [0, 4], sizes = [8, 252], strides = [1, 1]} : vector<8x256xf32> to vector<8x252xf32>
    %40 = vector.extract_strided_slice %18 {offsets = [0, 0], sizes = [8, 4], strides = [1, 1]} : vector<8x256xf32> to vector<8x4xf32>
    %41 = tpu.concatenate %39, %40 in 1 : vector<8x252xf32>, vector<8x4xf32> -> vector<8x256xf32>
    %42 = vector.broadcast %4 : f32 to vector<8x256xf32>
    %43 = arith.mulf %42, %41 : vector<8x256xf32>
    %44 = arith.addf %38, %43 : vector<8x256xf32>
    %45 = vector.broadcast %15 : f32 to vector<8x256xf32>
    %46 = arith.addf %44, %45 : vector<8x256xf32>
    %cst = arith.constant 0.000000e+00 : f32
    %47 = vector.broadcast %cst : f32 to vector<8x256xf32>
    %48 = arith.maximumf %46, %47 : vector<8x256xf32>
    %49 = vector.broadcast %5 : f32 to vector<8x256xf32>
    %50 = arith.mulf %49, %48 : vector<8x256xf32>
    %51 = vector.extract_strided_slice %48 {offsets = [0, 1], sizes = [8, 255], strides = [1, 1]} : vector<8x256xf32> to vector<8x255xf32>
    %52 = vector.extract_strided_slice %48 {offsets = [0, 0], sizes = [8, 1], strides = [1, 1]} : vector<8x256xf32> to vector<8x1xf32>
    %53 = tpu.concatenate %51, %52 in 1 : vector<8x255xf32>, vector<8x1xf32> -> vector<8x256xf32>
    %54 = vector.broadcast %6 : f32 to vector<8x256xf32>
    %55 = arith.mulf %54, %53 : vector<8x256xf32>
    %56 = arith.addf %50, %55 : vector<8x256xf32>
    %57 = vector.extract_strided_slice %48 {offsets = [0, 2], sizes = [8, 254], strides = [1, 1]} : vector<8x256xf32> to vector<8x254xf32>
    %58 = vector.extract_strided_slice %48 {offsets = [0, 0], sizes = [8, 2], strides = [1, 1]} : vector<8x256xf32> to vector<8x2xf32>
    %59 = tpu.concatenate %57, %58 in 1 : vector<8x254xf32>, vector<8x2xf32> -> vector<8x256xf32>
    %60 = vector.broadcast %7 : f32 to vector<8x256xf32>
    %61 = arith.mulf %60, %59 : vector<8x256xf32>
    %62 = arith.addf %56, %61 : vector<8x256xf32>
    %63 = vector.extract_strided_slice %48 {offsets = [0, 3], sizes = [8, 253], strides = [1, 1]} : vector<8x256xf32> to vector<8x253xf32>
    %64 = vector.extract_strided_slice %48 {offsets = [0, 0], sizes = [8, 3], strides = [1, 1]} : vector<8x256xf32> to vector<8x3xf32>
    %65 = tpu.concatenate %63, %64 in 1 : vector<8x253xf32>, vector<8x3xf32> -> vector<8x256xf32>
    %66 = vector.broadcast %8 : f32 to vector<8x256xf32>
    %67 = arith.mulf %66, %65 : vector<8x256xf32>
    %68 = arith.addf %62, %67 : vector<8x256xf32>
    %69 = vector.extract_strided_slice %48 {offsets = [0, 4], sizes = [8, 252], strides = [1, 1]} : vector<8x256xf32> to vector<8x252xf32>
    %70 = vector.extract_strided_slice %48 {offsets = [0, 0], sizes = [8, 4], strides = [1, 1]} : vector<8x256xf32> to vector<8x4xf32>
    %71 = tpu.concatenate %69, %70 in 1 : vector<8x252xf32>, vector<8x4xf32> -> vector<8x256xf32>
    %72 = vector.broadcast %9 : f32 to vector<8x256xf32>
    %73 = arith.mulf %72, %71 : vector<8x256xf32>
    %74 = arith.addf %68, %73 : vector<8x256xf32>
    %75 = vector.broadcast %16 : f32 to vector<8x256xf32>
    %76 = arith.addf %74, %75 : vector<8x256xf32>
    %cst_30 = arith.constant 0.000000e+00 : f32
    %77 = vector.broadcast %cst_30 : f32 to vector<8x256xf32>
    %78 = arith.maximumf %76, %77 : vector<8x256xf32>
    %79 = vector.broadcast %10 : f32 to vector<8x256xf32>
    %80 = arith.mulf %79, %78 : vector<8x256xf32>
    %81 = vector.extract_strided_slice %78 {offsets = [0, 1], sizes = [8, 255], strides = [1, 1]} : vector<8x256xf32> to vector<8x255xf32>
    %82 = vector.extract_strided_slice %78 {offsets = [0, 0], sizes = [8, 1], strides = [1, 1]} : vector<8x256xf32> to vector<8x1xf32>
    %83 = tpu.concatenate %81, %82 in 1 : vector<8x255xf32>, vector<8x1xf32> -> vector<8x256xf32>
    %84 = vector.broadcast %11 : f32 to vector<8x256xf32>
    %85 = arith.mulf %84, %83 : vector<8x256xf32>
    %86 = arith.addf %80, %85 : vector<8x256xf32>
    %87 = vector.extract_strided_slice %78 {offsets = [0, 2], sizes = [8, 254], strides = [1, 1]} : vector<8x256xf32> to vector<8x254xf32>
    %88 = vector.extract_strided_slice %78 {offsets = [0, 0], sizes = [8, 2], strides = [1, 1]} : vector<8x256xf32> to vector<8x2xf32>
    %89 = tpu.concatenate %87, %88 in 1 : vector<8x254xf32>, vector<8x2xf32> -> vector<8x256xf32>
    %90 = vector.broadcast %12 : f32 to vector<8x256xf32>
    %91 = arith.mulf %90, %89 : vector<8x256xf32>
    %92 = arith.addf %86, %91 : vector<8x256xf32>
    %93 = vector.extract_strided_slice %78 {offsets = [0, 3], sizes = [8, 253], strides = [1, 1]} : vector<8x256xf32> to vector<8x253xf32>
    %94 = vector.extract_strided_slice %78 {offsets = [0, 0], sizes = [8, 3], strides = [1, 1]} : vector<8x256xf32> to vector<8x3xf32>
    %95 = tpu.concatenate %93, %94 in 1 : vector<8x253xf32>, vector<8x3xf32> -> vector<8x256xf32>
    %96 = vector.broadcast %13 : f32 to vector<8x256xf32>
    %97 = arith.mulf %96, %95 : vector<8x256xf32>
    %98 = arith.addf %92, %97 : vector<8x256xf32>
    %99 = vector.extract_strided_slice %78 {offsets = [0, 4], sizes = [8, 252], strides = [1, 1]} : vector<8x256xf32> to vector<8x252xf32>
    %100 = vector.extract_strided_slice %78 {offsets = [0, 0], sizes = [8, 4], strides = [1, 1]} : vector<8x256xf32> to vector<8x4xf32>
    %101 = tpu.concatenate %99, %100 in 1 : vector<8x252xf32>, vector<8x4xf32> -> vector<8x256xf32>
    %102 = vector.broadcast %14 : f32 to vector<8x256xf32>
    %103 = arith.mulf %102, %101 : vector<8x256xf32>
    %104 = arith.addf %98, %103 : vector<8x256xf32>
    %105 = vector.broadcast %17 : f32 to vector<8x256xf32>
    %106 = arith.addf %104, %105 : vector<8x256xf32>
    %cst_31 = arith.constant 0.000000e+00 : f32
    %107 = vector.broadcast %cst_31 : f32 to vector<8x256xf32>
    %108 = arith.maximumf %106, %107 : vector<8x256xf32>
    %109 = arith.truncf %108 : vector<8x256xf32> to vector<8x256xbf16>
    %c0_32 = arith.constant 0 : index
    %c0_33 = arith.constant 0 : index
    %110 = vector.load %arg4[%c0_32, %c0_33] : memref<256x256xbf16, #tpu.memory_space<vmem>>, vector<256x256xbf16>
    %cst_34 = arith.constant dense<0.000000e+00> : vector<8x256xf32>
    %111 = tpu.matmul %109, %110, %cst_34 {dimension_numbers = #tpu.dot_dimension_numbers<[1], [0], [0], [1], [0, 0, 1, 1], [], []>} : vector<8x256xbf16>, vector<256x256xbf16>, vector<8x256xf32> -> vector<8x256xf32>
    %c0_35 = arith.constant 0 : index
    %c0_36 = arith.constant 0 : index
    %112 = vector.load %arg5[%c0_35, %c0_36] : memref<1x256xf32, #tpu.memory_space<vmem>>, vector<1x256xf32>
    %113 = vector.broadcast %112 : vector<1x256xf32> to vector<8x256xf32>
    %114 = arith.addf %111, %113 : vector<8x256xf32>
    %cst_37 = arith.constant 0.000000e+00 : f32
    %115 = vector.broadcast %cst_37 : f32 to vector<8x256xf32>
    %116 = arith.maximumf %114, %115 : vector<8x256xf32>
    %117 = arith.truncf %116 : vector<8x256xf32> to vector<8x256xbf16>
    %c0_38 = arith.constant 0 : index
    %c0_39 = arith.constant 0 : index
    %118 = vector.load %arg6[%c0_38, %c0_39] : memref<256x256xbf16, #tpu.memory_space<vmem>>, vector<256x256xbf16>
    %cst_40 = arith.constant dense<0.000000e+00> : vector<8x256xf32>
    %119 = tpu.matmul %117, %118, %cst_40 {dimension_numbers = #tpu.dot_dimension_numbers<[1], [0], [0], [1], [0, 0, 1, 1], [], []>} : vector<8x256xbf16>, vector<256x256xbf16>, vector<8x256xf32> -> vector<8x256xf32>
    %c0_41 = arith.constant 0 : index
    %c0_42 = arith.constant 0 : index
    %120 = vector.load %arg7[%c0_41, %c0_42] : memref<1x256xf32, #tpu.memory_space<vmem>>, vector<1x256xf32>
    %121 = vector.broadcast %120 : vector<1x256xf32> to vector<8x256xf32>
    %122 = arith.addf %119, %121 : vector<8x256xf32>
    %cst_43 = arith.constant 0.000000e+00 : f32
    %123 = vector.broadcast %cst_43 : f32 to vector<8x256xf32>
    %124 = arith.maximumf %122, %123 : vector<8x256xf32>
    %125 = arith.truncf %124 : vector<8x256xf32> to vector<8x256xbf16>
    %c0_44 = arith.constant 0 : index
    %c0_45 = arith.constant 0 : index
    %126 = vector.load %arg8[%c0_44, %c0_45] : memref<256x256xbf16, #tpu.memory_space<vmem>>, vector<256x256xbf16>
    %cst_46 = arith.constant dense<0.000000e+00> : vector<8x256xf32>
    %127 = tpu.matmul %125, %126, %cst_46 {dimension_numbers = #tpu.dot_dimension_numbers<[1], [0], [0], [1], [0, 0, 1, 1], [], []>} : vector<8x256xbf16>, vector<256x256xbf16>, vector<8x256xf32> -> vector<8x256xf32>
    %c0_47 = arith.constant 0 : index
    %c0_48 = arith.constant 0 : index
    %128 = vector.load %arg9[%c0_47, %c0_48] : memref<1x256xf32, #tpu.memory_space<vmem>>, vector<1x256xf32>
    %129 = vector.broadcast %128 : vector<1x256xf32> to vector<8x256xf32>
    %130 = arith.addf %127, %129 : vector<8x256xf32>
    %cst_49 = arith.constant 0.000000e+00 : f32
    %131 = vector.broadcast %cst_49 : f32 to vector<8x256xf32>
    %132 = arith.maximumf %130, %131 : vector<8x256xf32>
    %c0_50 = arith.constant 0 : index
    %c0_51 = arith.constant 0 : index
    %133 = vector.load %arg10[%c0_50, %c0_51] : memref<1x256xf32, #tpu.memory_space<vmem>>, vector<1x256xf32>
    %134 = vector.broadcast %133 : vector<1x256xf32> to vector<8x256xf32>
    %135 = arith.mulf %132, %134 : vector<8x256xf32>
    %cst_52 = arith.constant dense<0.000000e+00> : vector<8xf32>
    %136 = vector.multi_reduction <add>, %135, %cst_52 [1] : vector<8x256xf32> to vector<8xf32>
    %137 = vector.shape_cast %136 : vector<8xf32> to vector<8x1xf32>
    %c0_53 = arith.constant 0 : index
    %c0_54 = arith.constant 0 : index
    %138 = vector.load %arg11[%c0_53, %c0_54] : memref<1x1xf32, #tpu.memory_space<vmem>>, vector<1x1xf32>
    %139 = vector.broadcast %138 : vector<1x1xf32> to vector<8x1xf32>
    %140 = arith.addf %137, %139 : vector<8x1xf32>
    %c0_55 = arith.constant 0 : index
    %c0_56 = arith.constant 0 : index
    %141 = vector.load %arg12[%c0_55, %c0_56] : memref<8x1xf32, #tpu.memory_space<vmem>>, vector<8x1xf32>
    tpu.vector_store %arg12[%c0_55, %c0_56], %140 {strides = array<i32>} : memref<8x1xf32, #tpu.memory_space<vmem>>, vector<8x1xf32>,
    return
  }
  func.func @transform_0(%arg0: i32) -> (i32, i32) {
    %c0_i32 = arith.constant 0 : i32
    %c0_i32_0 = arith.constant 0 : i32
    return %arg0, %c0_i32 : i32, i32
  }
  func.func @transform_1(%arg0: i32) -> (i32, i32) {
    %c0_i32 = arith.constant 0 : i32
    %c0_i32_0 = arith.constant 0 : i32
    %c0_i32_1 = arith.constant 0 : i32
    return %c0_i32, %c0_i32_0 : i32, i32
  }
  func.func @transform_2(%arg0: i32) -> i32 {
    %c0_i32 = arith.constant 0 : i32
    %c0_i32_0 = arith.constant 0 : i32
    return %c0_i32 : i32
  }
  func.func @transform_3(%arg0: i32) -> (i32, i32) {
    %c0_i32 = arith.constant 0 : i32
    %c0_i32_0 = arith.constant 0 : i32
    %c0_i32_1 = arith.constant 0 : i32
    return %c0_i32, %c0_i32_0 : i32, i32
  }
  func.func @transform_4(%arg0: i32) -> (i32, i32) {
    %c0_i32 = arith.constant 0 : i32
    %c0_i32_0 = arith.constant 0 : i32
    %c0_i32_1 = arith.constant 0 : i32
    return %c0_i32, %c0_i32_0 : i32, i32
  }
  func.func @transform_5(%arg0: i32) -> (i32, i32) {
    %c0_i32 = arith.constant 0 : i32
    %c0_i32_0 = arith.constant 0 : i32
    %c0_i32_1 = arith.constant 0 : i32
    return %c0_i32, %c0_i32_0 : i32, i32
  }
  func.func @transform_6(%arg0: i32) -> (i32, i32) {
    %c0_i32 = arith.constant 0 : i32
    %c0_i32_0 = arith.constant 0 : i32
    %c0_i32_1 = arith.constant 0 : i32
    return %c0_i32, %c0_i32_0 : i32, i32
  }
  func.func @transform_7(%arg0: i32) -> (i32, i32) {
    %c0_i32 = arith.constant 0 : i32
    %c0_i32_0 = arith.constant 0 : i32
    %c0_i32_1 = arith.constant 0 : i32
    return %c0_i32, %c0_i32_0 : i32, i32
  }
  func.func @transform_8(%arg0: i32) -> (i32, i32) {
    %c0_i32 = arith.constant 0 : i32
    %c0_i32_0 = arith.constant 0 : i32
    %c0_i32_1 = arith.constant 0 : i32
    return %c0_i32, %c0_i32_0 : i32, i32
  }
  func.func @transform_9(%arg0: i32) -> (i32, i32) {
    %c0_i32 = arith.constant 0 : i32
    %c0_i32_0 = arith.constant 0 : i32
    %c0_i32_1 = arith.constant 0 : i32
    return %c0_i32, %c0_i32_0 : i32, i32
  }
  func.func @transform_10(%arg0: i32) -> (i32, i32) {
    %c0_i32 = arith.constant 0 : i32
    %c0_i32_0 = arith.constant 0 : i32
    %c0_i32_1 = arith.constant 0 : i32
    return %c0_i32, %c0_i32_0 : i32, i32
  }
  func.func @transform_11(%arg0: i32) -> (i32, i32) {
    %c0_i32 = arith.constant 0 : i32
    %c0_i32_0 = arith.constant 0 : i32
    return %arg0, %c0_i32 : i32, i32
  }
}

</mosaic_0001>

<bundles_post_ra>
// kernel: tpu_custom_call.1
= control target key start
LH: loop header
LB: loop body
LE: loop exit
PB: predicated region body
PF: predicated region fallthrough
CT: control target
= control target key end

     0   :  { %s1768_s0 = inlined_call_operand.hbm [shape: f32[8,256], index: 0, kind: input, shape index: {}]   ;;  %s1769_s1 = inlined_call_operand.vmem [shape: f32[3,5], index: 1, kind: input, shape index: {}]   ;;  %s1770_s2 = inlined_call_operand.vmem [shape: f32[3], index: 2, kind: input, shape index: {}]   ;;  %s1771_s3 = inlined_call_operand.hbm [shape: bf16[256,256], index: 3, kind: input, shape index: {}]   ;;  %s1772_s4 = inlined_call_operand.vmem [shape: f32[1,256], index: 4, kind: input, shape index: {}]   ;;  %s1773_s5 = inlined_call_operand.hbm [shape: bf16[256,256], index: 5, kind: input, shape index: {}]   ;;  %s1774_s6 = inlined_call_operand.vmem [shape: f32[1,256], index: 6, kind: input, shape index: {}]   ;;  %s1775_s7 = inlined_call_operand.hbm [shape: bf16[256,256], index: 7, kind: input, shape index: {}]   ;;  %s1776_s8 = inlined_call_operand.vmem [shape: f32[1,256], index: 8, kind: input, shape index: {}]   ;;  %s1777_s9 = inlined_call_operand.vmem [shape: f32[1,256], index: 9, kind: input, shape index: {}]   ;;  %s1778_s10 = inlined_call_operand.<no memory space> [shape: f32[1,1], index: 10, kind: input, shape index: {}]   ;;  %s1779_s11 = inlined_call_operand.vmem [shape: f32[8,1], index: 11, kind: output, shape index: {}]  }
   0x1   :  { %v16_v0 = vstv %s1778_s10 }
   0x2   :  { %17 = vst [vmem:[#allocation2] sm:$0x1] %v16_v0 }
   0x3   :  { %18 = vsyncpa [#allocation4], 0 }
   0x4   :  { %19 = vsyncpa [#allocation5], 0 }
   0x5   :  { %20 = vsyncpa [#allocation8], 0 }
   0x6   :  { %21 = vsyncpa [#allocation10], 0 }
   0x7   :  { %22 = vsyncpa [#allocation13], 0  ;;  %s1514_s19 = smov [#allocation9]   ;;  %s1392_s23 = scalar_lea.hbm %s1771_s3, 4096 }
   0x8   :  { %s58_s20 = sshll.u32 %s1514_s19, 4  ;;  %p1393_p0 = scmp.ne.s32.totalorder %s1771_s3, %s1392_s23  ;;  %s59_s20 = int_to_ptr.vmem [resolvable:$true] %s58_s20 }
   0x9   :  { %p1396_p1 = scmp.lt.u32.totalorder %s1392_s23, %s1771_s3 }
   0xb   :  { %p1398_p2 = pnand %p1396_p1, %p1393_p0 }
   0xd   :  { %1401 = shalt.err (!%p1398_p2)
}
   0xe   :  { %s1402_s10 = scalar_lea.vmem %s59_s20, 4096  ;;  %p1407_p4 = scmp.lt.s32.totalorder %s59_s20, %s59_s20 }
   0xf   :  { %p1403_p3 = scmp.ne.s32.totalorder %s59_s20, %s1402_s10  ;;  %p1408_p5 = scmp.lt.s32.totalorder %s1402_s10, %s1402_s10 }
  0x11   :  { %p1409_p6 = por %p1408_p5, %p1407_p4 }
  0x13   :  { %p1410_p7 = pnand %p1409_p6, %p1403_p3 }
  0x15   :  { %1413 = shalt.err (!%p1410_p7)
}
  0x16   :  { %s1515_s28 = smov 128   ;;  %s1516_s29 = smov 8  }
  0x17   :  { %64 = dma.hbm_to_vmem [thread:$0]  %s1771_s3, 4096, %s59_s20, [#allocation10], %s1515_s28, %s1515_s28, %s1516_s29  }
  0x18   :  { %s1517_s13 = smov [#allocation3]   ;;  %s39_s17 = sshll.u32 %s1769_s1, 4  ;;  %s40_s17 = int_to_ptr.vmem [resolvable:$true] %s39_s17 }
  0x19   :  { %s29_s14 = sshll.u32 %s1517_s13, 4  ;;  %s1414_s21 = scalar_lea.hbm %s1768_s0, 256  ;;  %s30_s14 = int_to_ptr.vmem [resolvable:$true] %s29_s14 }
  0x1a   :  { %p1415_p8 = scmp.ne.s32.totalorder %s1768_s0, %s1414_s21  ;;  %p1418_p9 = scmp.lt.u32.totalorder %s1414_s21, %s1768_s0 }
  0x1c   :  { %p1420_p10 = pnand %p1418_p9, %p1415_p8 }
  0x1e   :  { %1423 = shalt.err (!%p1420_p10)
}
  0x1f   :  { %s1424_s3 = scalar_lea.vmem %s30_s14, 256  ;;  %p1429_p12 = scmp.lt.s32.totalorder %s30_s14, %s30_s14 }
  0x20   :  { %p1425_p11 = scmp.ne.s32.totalorder %s30_s14, %s1424_s3  ;;  %p1430_p13 = scmp.lt.s32.totalorder %s1424_s3, %s1424_s3 }
  0x22   :  { %p1431_p0 = por %p1430_p13, %p1429_p12 }
  0x24   :  { %p1432_p1 = pnand %p1431_p0, %p1425_p11 }
  0x26   :  { %1435 = shalt.err (!%p1432_p1)
}
  0x27   :  { %32 = dma.hbm_to_vmem [thread:$0]  %s1768_s0, 256, %s30_s14, [#allocation4]  }
  0x28   :  { %s49_s10 = sshll.u32 %s1770_s2, 4  ;;  %s1436_s30 = scalar_lea.vmem %s40_s17, 64  ;;  %s50_s10 = int_to_ptr.vmem [resolvable:$true] %s49_s10 }
  0x29   :  { %p1437_p2 = scmp.ne.s32.totalorder %s40_s17, %s1436_s30  ;;  %p1441_p3 = scmp.lt.s32.totalorder %s40_s17, %s40_s17 }
  0x2a   :  { %p1442_p4 = scmp.lt.s32.totalorder %s1436_s30, %s1436_s30 }
  0x2c   :  { %p1443_p5 = por %p1442_p4, %p1441_p3 }
  0x2e   :  { %p1444_p6 = pnand %p1443_p5, %p1437_p2 }
  0x30   :  { %1447 = shalt.err (!%p1444_p6)
}
  0x31   :  { %s1518_s12 = smov [#allocation6]   ;;  %s1448_s13 = scalar_lea.vmem %s50_s10, 16 }
  0x32   :  { %42 = dma.vmem_to_smem %s40_s17, 64, %s1518_s12, [#allocation5]  }
  0x33   :  { %p1449_p7 = scmp.ne.s32.totalorder %s50_s10, %s1448_s13  ;;  %p1453_p8 = scmp.lt.s32.totalorder %s50_s10, %s50_s10 }
  0x34   :  { %p1454_p9 = scmp.lt.s32.totalorder %s1448_s13, %s1448_s13 }
  0x36   :  { %p1455_p10 = por %p1454_p9, %p1453_p8 }
  0x38   :  { %p1456_p11 = pnand %p1455_p10, %p1449_p7 }
  0x3a   :  { %1459 = shalt.err (!%p1456_p11)
}
  0x3b   :  { %s1519_s0 = smov [#allocation7]   ;;  %s1520_s2 = smov [#allocation11]  }
  0x3c   :  { %52 = dma.vmem_to_smem %s50_s10, 16, %s1519_s0, [#allocation8]  }
  0x3d   :  { %s72_s14 = sshll.u32 %s1520_s2, 4  ;;  %s1521_s15 = smov [#allocation12]   ;;  %s73_s14 = int_to_ptr.vmem [resolvable:$true] %s72_s14 }
  0x3e   :  { %s86_s16 = sshll.u32 %s1521_s15, 4  ;;  %s1460_s17 = scalar_lea.hbm %s1773_s5, 4096  ;;  %s1622_s16 = int_to_ptr.vmem [resolvable:$true] %s86_s16 }
  0x3f   :  { %p1461_p12 = scmp.ne.s32.totalorder %s1773_s5, %s1460_s17  ;;  %p1464_p13 = scmp.lt.u32.totalorder %s1460_s17, %s1773_s5 }
  0x41   :  { %p1466_p0 = pnand %p1464_p13, %p1461_p12 }
  0x43   :  { %1469 = shalt.err (!%p1466_p0)
}
  0x44   :  { %s1470_s25 = scalar_lea.vmem %s73_s14, 4096  ;;  %p1475_p2 = scmp.lt.s32.totalorder %s73_s14, %s73_s14 }
  0x45   :  { %p1471_p1 = scmp.ne.s32.totalorder %s73_s14, %s1470_s25  ;;  %p1476_p3 = scmp.lt.s32.totalorder %s1470_s25, %s1470_s25 }
  0x47   :  { %p1477_p4 = por %p1476_p3, %p1475_p2 }
  0x49   :  { %p1478_p5 = pnand %p1477_p4, %p1471_p1 }
  0x4b   :  { %1481 = shalt.err (!%p1478_p5)
}
  0x4c   :  { %78 = dma.hbm_to_vmem [thread:$0]  %s1773_s5, 4096, %s73_s14, [#allocation10], %s1515_s28, %s1515_s28, %s1516_s29  }
  0x4d   :  { %s1482_s27 = scalar_lea.hbm %s1775_s7, 4096 }
  0x4e   :  { %p1483_p6 = scmp.ne.s32.totalorder %s1775_s7, %s1482_s27  ;;  %p1486_p7 = scmp.lt.u32.totalorder %s1482_s27, %s1775_s7 }
  0x50   :  { %p1488_p8 = pnand %p1486_p7, %p1483_p6 }
  0x52   :  { %1491 = shalt.err (!%p1488_p8)
}
  0x53   :  { %s1492_s0 = scalar_lea.vmem %s1622_s16, 4096  ;;  %p1497_p10 = scmp.lt.s32.totalorder %s1622_s16, %s1622_s16 }
  0x54   :  { %p1493_p9 = scmp.ne.s32.totalorder %s1622_s16, %s1492_s0  ;;  %p1498_p11 = scmp.lt.s32.totalorder %s1492_s0, %s1492_s0 }
  0x56   :  { %p1499_p12 = por %p1498_p11, %p1497_p10 }
  0x58   :  { %p1500_p13 = pnand %p1499_p12, %p1493_p9 }
  0x5a   :  { %1503 = shalt.err (!%p1500_p13)
}
  0x5b   :  { %92 = dma.hbm_to_vmem [thread:$0]  %s1775_s7, 4096, %s1622_s16, [#allocation13], %s1515_s28, %s1515_s28, %s1516_s29  }
  0x5c   :  { %1504 = dma.done.wait [#allocation4], 256  }
  0x5d   :  { %1505 = vsyncadd [#allocation4], 4294967040 }
  0x5e   :  { %1506 = dma.done.wait [#allocation5], 64  }
  0x5f   :  { %1507 = vsyncadd [#allocation5], 4294967232 }
  0x60   :  { %1508 = dma.done.wait [#allocation8], 16  }
  0x61   :  { %1509 = vsyncadd [#allocation8], 4294967280 }
  0x62   :  { %1510 = dma.done.wait [#allocation10], 8192  }
  0x63   :  { %1511 = vsyncadd [#allocation10], 4294959104 }
  0x64   :  { %1512 = dma.done.wait [#allocation13], 4096  }
  0x65   :  { %1513 = vsyncadd [#allocation13], 4294963200 }
  0x66   :  { %117 = sfence }
  0x67   :  { %v136_v1 = vld [vmem:[#allocation3] sm:$0xff]  ;;  %s1522_s14 = smov 126   ;;  %s1523_s15 = smov 127   ;;  %v137_v2 = vld [vmem:[#allocation3 + $0x8] sm:$0xff]  ;;  %vm162_vm0 = vcmask 1031168   ;;  %vm147_vm1 = vcmask 1039360  }
  0x68   :  { %158 = vrot.lane.b32.xlu1 %v136_v1, %s1522_s14  ;;  %143 = vrot.lane.b32.xlu0 %v136_v1, %s1523_s15  ;;  %s1524_s7 = smov 125   ;;  %s1525_s28 = smov 124   ;;  %vm177_vm2 = vcmask 1022976   ;;  %vm192_vm3 = vcmask 1014784   ;;  %v1248_v47 = vld [vmem:[#allocation9 + $0x4] ss:$8 sps:$4 sm:$0xff]  }
  0x69   :  { %s118_s29 = sld [smem:[#allocation6]]  ;;  %s1123_s16 = sld [smem:[#allocation6 + $0x1]]  ;;  %v1250_v48 = vld [vmem:[#allocation9] ss:$8 sps:$4 sm:$0xff]   ;;  %v1251_v49 = vld [vmem:[#allocation9 + $0x14] ss:$8 sps:$4 sm:$0xff]   ;;  %546 = vmatprep.subr.bf16.mxu0 %v1248_v47 }
  0x6a   :  { %s1124_s18 = sld [smem:[#allocation6 + $0x2]]  ;;  %s1667_s19 = sld [smem:[#allocation6 + $0x3]]  ;;  %547 = vmatpush1.bf16.msra.mxu0 %v1250_v48  ;;  %v1253_v50 = vld [vmem:[#allocation9 + $0x10] ss:$8 sps:$4 sm:$0xff]   ;;  %v1254_v51 = vld [vmem:[#allocation9 + $0x24] ss:$8 sps:$4 sm:$0xff]  }
  0x6b   :  { %s1669_s17 = sld [smem:[#allocation6 + $0x4]]  ;;  %s133_s21 = sld [smem:[#allocation7]]  ;;  %548 = vmatprep.subr.bf16.mxu0 %v1251_v49  ;;  %v1256_v52 = vld [vmem:[#allocation9 + $0x20] ss:$8 sps:$4 sm:$0xff]   ;;  %v1257_v53 = vld [vmem:[#allocation9 + $0x34] ss:$8 sps:$4 sm:$0xff]  }
  0x6c   :  { %160 = vrot.lane.b32.xlu1 %v137_v2, %s1522_s14  ;;  %145 = vrot.lane.b32.xlu0 %v137_v2, %s1523_s15  ;;  %v1259_v54 = vld [vmem:[#allocation9 + $0x30] ss:$8 sps:$4 sm:$0xff]   ;;  %v1260_v55 = vld [vmem:[#allocation9 + $0x44] ss:$8 sps:$4 sm:$0xff]   ;;  %v1262_v56 = vld [vmem:[#allocation9 + $0x40] ss:$8 sps:$4 sm:$0xff]  }
  0x6d   :  { %v1263_v57 = vld [vmem:[#allocation9 + $0x54] ss:$8 sps:$4 sm:$0xff]   ;;  %v1265_v58 = vld [vmem:[#allocation9 + $0x50] ss:$8 sps:$4 sm:$0xff]   ;;  %v1266_v59 = vld [vmem:[#allocation9 + $0x64] ss:$8 sps:$4 sm:$0xff]  }
  0x6e   :  { %549 = vmatpush1.bf16.msra.mxu0 %v1253_v50  ;;  %v1268_v60 = vld [vmem:[#allocation9 + $0x60] ss:$8 sps:$4 sm:$0xff]   ;;  %v1269_v61 = vld [vmem:[#allocation9 + $0x74] ss:$8 sps:$4 sm:$0xff]   ;;  %v1271_v62 = vld [vmem:[#allocation9 + $0x70] ss:$8 sps:$4 sm:$0xff]  }
  0x6f   :  { %v138_v5 = vstv %s118_s29  ;;  %v153_v6 = vstv %s1123_s16  ;;  %550 = vmatprep.subr.bf16.mxu0 %v1254_v51  ;;  %v1272_v63 = vld [vmem:[#allocation9 + $0x84] ss:$8 sps:$4 sm:$0xff]   ;;  %v1274_v0 = vld [vmem:[#allocation9 + $0x80] ss:$8 sps:$4 sm:$0xff]   ;;  %s1128_s22 = sld [smem:[#allocation6 + $0x81]]  ;;  %s1127_s23 = sld [smem:[#allocation6 + $0x80]] }
  0x70   :  { %175 = vrot.lane.b32.xlu1 %v137_v2, %s1524_s7  ;;  %173 = vrot.lane.b32.xlu0 %v136_v1, %s1524_s7  ;;  %v168_v8 = vstv %s1124_s18  ;;  %v139_v10 = vmul.f32 %v138_v5, %v136_v1  ;;  %v140_v11 = vmul.f32 %v138_v5, %v137_v2  ;;  %v183_v18 = vstv %s1667_s19  ;;  %s1129_s24 = sld [smem:[#allocation6 + $0x82]]  ;;  %s1701_s25 = sld [smem:[#allocation6 + $0x83]]  ;;  %v1286_v48 = vld [vmem:[#allocation9 + $0xc0] ss:$8 sps:$4 sm:$0xff]   ;;  %v1287_v51 = vld [vmem:[#allocation9 + $0xd4] ss:$8 sps:$4 sm:$0xff]  }
  0x71   :  { %v198_v31 = vstv %s1669_s17  ;;  %v203_v40 = vstv %s133_s21  ;;  %s1705_s3 = sld [smem:[#allocation6 + $0x84]]  ;;  %s1710_s1 = sld [smem:[#allocation7 + $0x1]]  ;;  %vm1112_vm4 = vcmask 7168  }
  0x72   :  { %551 = vmatpush1.bf16.msra.mxu0 %v1256_v52  ;;  %s1133_s20 = sld [smem:[#allocation6 + $0x101]]  ;;  %s1132_s26 = sld [smem:[#allocation6 + $0x100]] }
  0x73   :  { %552 = vmatprep.subr.bf16.mxu0 %v1257_v53  ;;  %s1134_s27 = sld [smem:[#allocation6 + $0x102]]  ;;  %s1135_s10 = sld [smem:[#allocation6 + $0x103]] }
  0x74   :  { %190 = vrot.lane.b32.xlu1 %v137_v2, %s1525_s28  ;;  %188 = vrot.lane.b32.xlu0 %v136_v1, %s1525_s28  ;;  %v1275_v1 = vld [vmem:[#allocation9 + $0x94] ss:$8 sps:$4 sm:$0xff]   ;;  %v1277_v2 = vld [vmem:[#allocation9 + $0x90] ss:$8 sps:$4 sm:$0xff]   ;;  %s1742_s30 = sld [smem:[#allocation6 + $0x104]]  ;;  %s1138_s12 = sld [smem:[#allocation7 + $0x2]] }
  0x75   :  { %v222_v5 = vstv %s1128_s22 }
  0x76   :  { %553 = vmatpush1.bf16.msra.mxu0 %v1259_v54  ;;  %v1289_v54 = vld [vmem:[#allocation9 + $0xd0] ss:$8 sps:$4 sm:$0xff]  }
  0x77   :  { %554 = vmatprep.subr.bf16.mxu0 %v1260_v55  ;;  %v1290_v55 = vld [vmem:[#allocation9 + $0xe4] ss:$8 sps:$4 sm:$0xff]  }
  0x7a   :  { %555 = vmatpush1.bf16.msra.mxu0 %v1262_v56  ;;  %v1292_v56 = vld [vmem:[#allocation9 + $0xe0] ss:$8 sps:$4 sm:$0xff]  }
  0x7b   :  { %556 = vmatprep.subr.bf16.mxu0 %v1263_v57  ;;  %v1293_v57 = vld [vmem:[#allocation9 + $0xf4] ss:$8 sps:$4 sm:$0xff]  }
  0x7e   :  { %557 = vmatpush1.bf16.msra.mxu0 %v1265_v58  ;;  %v1295_v58 = vld [vmem:[#allocation9 + $0xf0] ss:$8 sps:$4 sm:$0xff]  }
  0x7f   :  { %558 = vmatprep.subr.bf16.mxu0 %v1266_v59  ;;  %v1296_v59 = vld [vmem:[#allocation11 + $0x4] ss:$8 sps:$4 sm:$0xff]  }
  0x80   :  { %795 = vmatprep.subr.bf16.mxu1 %v1296_v59 }
  0x82   :  { %559 = vmatpush1.bf16.msra.mxu0 %v1268_v60  ;;  %v1298_v60 = vld [vmem:[#allocation11] ss:$8 sps:$4 sm:$0xff]  }
  0x83   :  { %560 = vmatprep.subr.bf16.mxu0 %v1269_v61  ;;  %v1299_v61 = vld [vmem:[#allocation11 + $0x14] ss:$8 sps:$4 sm:$0xff]   ;;  %796 = vmatpush1.bf16.msra.mxu1 %v1298_v60  ;;  %v335_v60 = vstv %s1138_s12 }
  0x84   :  { %797 = vmatprep.subr.bf16.mxu1 %v1299_v61 }
  0x86   :  { %561 = vmatpush1.bf16.msra.mxu0 %v1271_v62  ;;  %v1301_v62 = vld [vmem:[#allocation11 + $0x10] ss:$8 sps:$4 sm:$0xff]  }
  0x87   :  { %562 = vmatprep.subr.bf16.mxu0 %v1272_v63  ;;  %v1302_v63 = vld [vmem:[#allocation11 + $0x24] ss:$8 sps:$4 sm:$0xff]   ;;  %798 = vmatpush1.bf16.msra.mxu1 %v1301_v62 }
  0x88   :  { %799 = vmatprep.subr.bf16.mxu1 %v1302_v63 }
  0x8a   :  { %563 = vmatpush1.bf16.msra.mxu0 %v1274_v0  ;;  %v1304_v0 = vld [vmem:[#allocation11 + $0x20] ss:$8 sps:$4 sm:$0xff]  }
  0x8b   :  { %564 = vmatprep.subr.bf16.mxu0 %v1275_v1  ;;  %v1305_v1 = vld [vmem:[#allocation11 + $0x34] ss:$8 sps:$4 sm:$0xff]   ;;  %800 = vmatpush1.bf16.msra.mxu1 %v1304_v0 }
  0x8c   :  { %801 = vmatprep.subr.bf16.mxu1 %v1305_v1 }
  0x8e   :  { %565 = vmatpush1.bf16.msra.mxu0 %v1277_v2  ;;  %v1307_v2 = vld [vmem:[#allocation11 + $0x30] ss:$8 sps:$4 sm:$0xff]  }
  0x8f   :  { %802 = vmatpush1.bf16.msra.mxu1 %v1307_v2 }
  0xda   :  { %v159_v3 = vpop.permute.xlu1 %158  ;;  %v144_v4 = vpop.permute.xlu0 %143 }
  0xde   :  { %v161_v7 = vpop.permute.xlu1 %160  ;;  %v146_v9 = vpop.permute.xlu0 %145 }
  0xdf   :  { %v163_v12 = vsel %vm162_vm0, %v159_v3, %v161_v7  ;;  %v167_v13 = vsel %vm162_vm0, %v161_v7, %v159_v3  ;;  %v148_v14 = vsel %vm147_vm1, %v144_v4, %v146_v9  ;;  %v152_v15 = vsel %vm147_vm1, %v146_v9, %v144_v4 }
  0xe0   :  { %v154_v16 = vmul.f32 %v153_v6, %v148_v14  ;;  %v155_v17 = vmul.f32 %v153_v6, %v152_v15  ;;  %v169_v19 = vmul.f32 %v168_v8, %v163_v12  ;;  %v170_v20 = vmul.f32 %v168_v8, %v167_v13 }
  0xe2   :  { %v156_v21 = vadd.f32 %v154_v16, %v139_v10  ;;  %v157_v22 = vadd.f32 %v155_v17, %v140_v11  ;;  %v176_v23 = vpop.permute.xlu1 %175  ;;  %v174_v24 = vpop.permute.xlu0 %173  ;;  %v208_v10 = vstv %s1127_s23  ;;  %v236_v11 = vstv %s1129_s24  ;;  %v1278_v17 = vld [vmem:[#allocation9 + $0xa4] ss:$8 sps:$4 sm:$0xff]  }
  0xe3   :  { %v178_v25 = vsel %vm177_vm2, %v174_v24, %v176_v23  ;;  %v182_v26 = vsel %vm177_vm2, %v176_v23, %v174_v24  ;;  %v250_v16 = vstv %s1701_s25  ;;  %v1280_v24 = vld [vmem:[#allocation9 + $0xa0] ss:$8 sps:$4 sm:$0xff]   ;;  %566 = vmatprep.subr.bf16.mxu0 %v1278_v17  ;;  %v1329_v17 = vld [vmem:[#allocation11 + $0xb4] ss:$8 sps:$4 sm:$0xff]  }
  0xe4   :  { %v171_v27 = vadd.f32 %v169_v19, %v156_v21  ;;  %v172_v28 = vadd.f32 %v170_v20, %v157_v22  ;;  %v184_v29 = vmul.f32 %v183_v18, %v178_v25  ;;  %v185_v30 = vmul.f32 %v183_v18, %v182_v26  ;;  %567 = vmatpush1.bf16.msra.mxu0 %v1280_v24 }
  0xe6   :  { %v191_v32 = vpop.permute.xlu1 %190  ;;  %v189_v33 = vpop.permute.xlu0 %188  ;;  %v186_v36 = vadd.f32 %v184_v29, %v171_v27  ;;  %v187_v37 = vadd.f32 %v185_v30, %v172_v28 }
  0xe7   :  { %v193_v34 = vsel %vm192_vm3, %v189_v33, %v191_v32  ;;  %v197_v35 = vsel %vm192_vm3, %v191_v32, %v189_v33  ;;  %v1281_v32 = vld [vmem:[#allocation9 + $0xb4] ss:$8 sps:$4 sm:$0xff]  }
  0xe8   :  { %v199_v38 = vmul.f32 %v198_v31, %v193_v34  ;;  %v200_v39 = vmul.f32 %v198_v31, %v197_v35  ;;  %v264_v31 = vstv %s1705_s3  ;;  %568 = vmatprep.subr.bf16.mxu0 %v1281_v32 }
  0xea   :  { %v201_v41 = vadd.f32 %v199_v38, %v186_v36  ;;  %v202_v42 = vadd.f32 %v200_v39, %v187_v37  ;;  %v1283_v37 = vld [vmem:[#allocation9 + $0xb0] ss:$8 sps:$4 sm:$0xff]  }
  0xeb   :  { %569 = vmatpush1.bf16.msra.mxu0 %v1283_v37 }
  0xec   :  { %v204_v43 = vadd.f32 %v203_v40, %v201_v41  ;;  %v205_v44 = vadd.f32 %v203_v40, %v202_v42 }
  0xee   :  { %v1681_v45 = vmax.f32 %v204_v43, 0.0  ;;  %v1683_v46 = vmax.f32 %v205_v44, 0.0  ;;  %v269_v44 = vstv %s1710_s1 }
  0xf0   :  { %215 = vrot.lane.b32.xlu1 %v1683_v46, %s1523_s15  ;;  %213 = vrot.lane.b32.xlu0 %v1681_v45, %s1523_s15  ;;  %v210_v18 = vmul.f32 %v208_v10, %v1683_v46  ;;  %v209_v19 = vmul.f32 %v208_v10, %v1681_v45  ;;  %v1319_v10 = vld [vmem:[#allocation11 + $0x70] ss:$8 sps:$4 sm:$0xff]  }
  0xf4   :  { %229 = vrot.lane.b32.xlu1 %v1683_v46, %s1522_s14  ;;  %227 = vrot.lane.b32.xlu0 %v1681_v45, %s1522_s14 }
  0xf8   :  { %243 = vrot.lane.b32.xlu1 %v1683_v46, %s1524_s7  ;;  %241 = vrot.lane.b32.xlu0 %v1681_v45, %s1524_s7 }
  0xfc   :  { %257 = vrot.lane.b32.xlu1 %v1683_v46, %s1525_s28  ;;  %255 = vrot.lane.b32.xlu0 %v1681_v45, %s1525_s28  ;;  %v1284_v45 = vld [vmem:[#allocation9 + $0xc4] ss:$8 sps:$4 sm:$0xff]  }
  0xfd   :  { %570 = vmatprep.subr.bf16.mxu0 %v1284_v45 }
  0xfe   :  { %571 = vmatpush1.bf16.msra.mxu0 %v1286_v48 }
  0xff   :  { %572 = vmatprep.subr.bf16.mxu0 %v1287_v51 }
 0x102   :  { %573 = vmatpush1.bf16.msra.mxu0 %v1289_v54 }
 0x103   :  { %574 = vmatprep.subr.bf16.mxu0 %v1290_v55 }
 0x106   :  { %575 = vmatpush1.bf16.msra.mxu0 %v1292_v56 }
 0x107   :  { %576 = vmatprep.subr.bf16.mxu0 %v1293_v57 }
 0x10a   :  { %577 = vmatpush1.bf16.msra.mxu0 %v1295_v58 }
 0x162   :  { %v216_v3 = vpop.permute.xlu1 %215  ;;  %v214_v4 = vpop.permute.xlu0 %213 }
 0x163   :  { %v217_v6 = vsel %vm147_vm1, %v214_v4, %v216_v3  ;;  %v221_v7 = vsel %vm147_vm1, %v216_v3, %v214_v4  ;;  %v1308_v3 = vld [vmem:[#allocation11 + $0x44] ss:$8 sps:$4 sm:$0xff]   ;;  %v1310_v4 = vld [vmem:[#allocation11 + $0x40] ss:$8 sps:$4 sm:$0xff]  }
 0x164   :  { %v223_v14 = vmul.f32 %v222_v5, %v217_v6  ;;  %v224_v15 = vmul.f32 %v222_v5, %v221_v7  ;;  %803 = vmatprep.subr.bf16.mxu1 %v1308_v3  ;;  %v1311_v5 = vld [vmem:[#allocation11 + $0x54] ss:$8 sps:$4 sm:$0xff]   ;;  %v1313_v6 = vld [vmem:[#allocation11 + $0x50] ss:$8 sps:$4 sm:$0xff]   ;;  %v1314_v7 = vld [vmem:[#allocation11 + $0x64] ss:$8 sps:$4 sm:$0xff]  }
 0x165   :  { %804 = vmatpush1.bf16.msra.mxu1 %v1310_v4 }
 0x166   :  { %v230_v8 = vpop.permute.xlu1 %229  ;;  %v228_v9 = vpop.permute.xlu0 %227  ;;  %v225_v27 = vadd.f32 %v223_v14, %v209_v19  ;;  %v226_v28 = vadd.f32 %v224_v15, %v210_v18  ;;  %805 = vmatprep.subr.bf16.mxu1 %v1311_v5  ;;  %v1325_v14 = vld [vmem:[#allocation11 + $0x90] ss:$8 sps:$4 sm:$0xff]   ;;  %v1326_v15 = vld [vmem:[#allocation11 + $0xa4] ss:$8 sps:$4 sm:$0xff]  }
 0x167   :  { %v231_v12 = vsel %vm162_vm0, %v228_v9, %v230_v8  ;;  %v235_v13 = vsel %vm162_vm0, %v230_v8, %v228_v9  ;;  %v1316_v8 = vld [vmem:[#allocation11 + $0x60] ss:$8 sps:$4 sm:$0xff]   ;;  %v1317_v9 = vld [vmem:[#allocation11 + $0x74] ss:$8 sps:$4 sm:$0xff]   ;;  %v1331_v18 = vld [vmem:[#allocation11 + $0xb0] ss:$8 sps:$4 sm:$0xff]  }
 0x168   :  { %v237_v20 = vmul.f32 %v236_v11, %v231_v12  ;;  %v238_v21 = vmul.f32 %v236_v11, %v235_v13  ;;  %v1320_v11 = vld [vmem:[#allocation11 + $0x84] ss:$8 sps:$4 sm:$0xff]   ;;  %v1322_v12 = vld [vmem:[#allocation11 + $0x80] ss:$8 sps:$4 sm:$0xff]   ;;  %v1323_v13 = vld [vmem:[#allocation11 + $0x94] ss:$8 sps:$4 sm:$0xff]  }
 0x169   :  { %806 = vmatpush1.bf16.msra.mxu1 %v1313_v6  ;;  %v1332_v19 = vld [vmem:[#allocation11 + $0xc4] ss:$8 sps:$4 sm:$0xff]   ;;  %v1340_v6 = vld [vmem:[#allocation11 + $0xe0] ss:$8 sps:$4 sm:$0xff]  }
 0x16a   :  { %v244_v22 = vpop.permute.xlu1 %243  ;;  %v242_v23 = vpop.permute.xlu0 %241  ;;  %v239_v33 = vadd.f32 %v237_v20, %v225_v27  ;;  %v240_v34 = vadd.f32 %v238_v21, %v226_v28  ;;  %807 = vmatprep.subr.bf16.mxu1 %v1314_v7  ;;  %v1334_v20 = vld [vmem:[#allocation11 + $0xc0] ss:$8 sps:$4 sm:$0xff]   ;;  %v1335_v21 = vld [vmem:[#allocation11 + $0xd4] ss:$8 sps:$4 sm:$0xff]   ;;  %v1338_v5 = vld [vmem:[#allocation11 + $0xe4] ss:$8 sps:$4 sm:$0xff]  }
 0x16b   :  { %v245_v25 = vsel %vm177_vm2, %v242_v23, %v244_v22  ;;  %v249_v26 = vsel %vm177_vm2, %v244_v22, %v242_v23  ;;  %v1337_v22 = vld [vmem:[#allocation11 + $0xd0] ss:$8 sps:$4 sm:$0xff]   ;;  %v1341_v7 = vld [vmem:[#allocation11 + $0xf4] ss:$8 sps:$4 sm:$0xff]  }
 0x16c   :  { %v251_v29 = vmul.f32 %v250_v16, %v245_v25  ;;  %v252_v30 = vmul.f32 %v250_v16, %v249_v26  ;;  %v1328_v16 = vld [vmem:[#allocation11 + $0xa0] ss:$8 sps:$4 sm:$0xff]   ;;  %v288_v25 = vstv %s1133_s20 }
 0x16d   :  { %808 = vmatpush1.bf16.msra.mxu1 %v1316_v8  ;;  %v1343_v8 = vld [vmem:[#allocation11 + $0xf0] ss:$8 sps:$4 sm:$0xff]  }
 0x16e   :  { %v258_v35 = vpop.permute.xlu1 %257  ;;  %v256_v36 = vpop.permute.xlu0 %255  ;;  %v253_v40 = vadd.f32 %v251_v29, %v239_v33  ;;  %v254_v41 = vadd.f32 %v252_v30, %v240_v34  ;;  %809 = vmatprep.subr.bf16.mxu1 %v1317_v9  ;;  %v274_v30 = vstv %s1132_s26  ;;  %v1344_v9 = vld [vmem:[#allocation12] ss:$8 sps:$4 sm:$0xff]  }
 0x16f   :  { %v259_v38 = vsel %vm192_vm3, %v256_v36, %v258_v35  ;;  %v263_v39 = vsel %vm192_vm3, %v258_v35, %v256_v36  ;;  %v316_v36 = vstv %s1135_s10 }
 0x170   :  { %v265_v42 = vmul.f32 %v264_v31, %v259_v38  ;;  %v266_v43 = vmul.f32 %v264_v31, %v263_v39  ;;  %v302_v31 = vstv %s1134_s27 }
 0x171   :  { %810 = vmatpush1.bf16.msra.mxu1 %v1319_v10  ;;  %v1346_v10 = vld [vmem:[#allocation12 + $0x4] ss:$8 sps:$4 sm:$0xff]  }
 0x172   :  { %v267_v46 = vadd.f32 %v265_v42, %v253_v40  ;;  %v268_v47 = vadd.f32 %v266_v43, %v254_v41  ;;  %811 = vmatprep.subr.bf16.mxu1 %v1320_v11  ;;  %v1349_v11 = vld [vmem:[#allocation12 + $0x14] ss:$8 sps:$4 sm:$0xff]   ;;  %1044 = vmatprep.subr.bf16.mxu0 %v1346_v10 }
 0x174   :  { %v270_v49 = vadd.f32 %v269_v44, %v267_v46  ;;  %v271_v50 = vadd.f32 %v269_v44, %v268_v47 }
 0x175   :  { %812 = vmatpush1.bf16.msra.mxu1 %v1322_v12  ;;  %v1347_v12 = vld [vmem:[#allocation12 + $0x10] ss:$8 sps:$4 sm:$0xff]  }
 0x176   :  { %v1720_v52 = vmax.f32 %v270_v49, 0.0  ;;  %v1722_v53 = vmax.f32 %v271_v50, 0.0  ;;  %813 = vmatprep.subr.bf16.mxu1 %v1323_v13  ;;  %v330_v49 = vstv %s1742_s30  ;;  %v1352_v13 = vld [vmem:[#allocation12 + $0x24] ss:$8 sps:$4 sm:$0xff]  }
 0x178   :  { %281 = vrot.lane.b32.xlu1 %v1722_v53, %s1523_s15  ;;  %279 = vrot.lane.b32.xlu0 %v1720_v52, %s1523_s15  ;;  %v276_v37 = vmul.f32 %v274_v30, %v1722_v53  ;;  %v275_v38 = vmul.f32 %v274_v30, %v1720_v52  ;;  %v1374_v30 = vld [vmem:[#allocation12 + $0xa0] ss:$8 sps:$4 sm:$0xff]  }
 0x179   :  { %814 = vmatpush1.bf16.msra.mxu1 %v1325_v14  ;;  %v1350_v14 = vld [vmem:[#allocation12 + $0x20] ss:$8 sps:$4 sm:$0xff]  }
 0x17a   :  { %815 = vmatprep.subr.bf16.mxu1 %v1326_v15  ;;  %v1355_v15 = vld [vmem:[#allocation12 + $0x34] ss:$8 sps:$4 sm:$0xff]  }
 0x17c   :  { %295 = vrot.lane.b32.xlu1 %v1722_v53, %s1522_s14  ;;  %293 = vrot.lane.b32.xlu0 %v1720_v52, %s1522_s14 }
 0x17d   :  { %816 = vmatpush1.bf16.msra.mxu1 %v1328_v16  ;;  %v1353_v16 = vld [vmem:[#allocation12 + $0x30] ss:$8 sps:$4 sm:$0xff]  }
 0x17e   :  { %817 = vmatprep.subr.bf16.mxu1 %v1329_v17  ;;  %v1358_v17 = vld [vmem:[#allocation12 + $0x44] ss:$8 sps:$4 sm:$0xff]  }
 0x180   :  { %309 = vrot.lane.b32.xlu1 %v1722_v53, %s1524_s7  ;;  %307 = vrot.lane.b32.xlu0 %v1720_v52, %s1524_s7 }
 0x181   :  { %818 = vmatpush1.bf16.msra.mxu1 %v1331_v18  ;;  %v1356_v18 = vld [vmem:[#allocation12 + $0x40] ss:$8 sps:$4 sm:$0xff]  }
 0x182   :  { %819 = vmatprep.subr.bf16.mxu1 %v1332_v19  ;;  %v1361_v19 = vld [vmem:[#allocation12 + $0x54] ss:$8 sps:$4 sm:$0xff]  }
 0x184   :  { %323 = vrot.lane.b32.xlu1 %v1722_v53, %s1525_s28  ;;  %321 = vrot.lane.b32.xlu0 %v1720_v52, %s1525_s28 }
 0x185   :  { %820 = vmatpush1.bf16.msra.mxu1 %v1334_v20  ;;  %v1359_v20 = vld [vmem:[#allocation12 + $0x50] ss:$8 sps:$4 sm:$0xff]  }
 0x186   :  { %821 = vmatprep.subr.bf16.mxu1 %v1335_v21  ;;  %v1364_v21 = vld [vmem:[#allocation12 + $0x64] ss:$8 sps:$4 sm:$0xff]  }
 0x189   :  { %822 = vmatpush1.bf16.msra.mxu1 %v1337_v22  ;;  %v1362_v22 = vld [vmem:[#allocation12 + $0x60] ss:$8 sps:$4 sm:$0xff]  }
 0x18a   :  { %823 = vmatprep.subr.bf16.mxu1 %v1338_v5 }
 0x18d   :  { %824 = vmatpush1.bf16.msra.mxu1 %v1340_v6 }
 0x18e   :  { %825 = vmatprep.subr.bf16.mxu1 %v1341_v7  ;;  %v872_v7 = vld [vmem:[%s1776_s8] sm:$0x3] }
 0x191   :  { %826 = vmatpush1.bf16.msra.mxu1 %v1343_v8 }
 0x1ea   :  { %v282_v23 = vpop.permute.xlu1 %281  ;;  %v280_v24 = vpop.permute.xlu0 %279 }
 0x1eb   :  { %v283_v26 = vsel %vm147_vm1, %v280_v24, %v282_v23  ;;  %v287_v27 = vsel %vm147_vm1, %v282_v23, %v280_v24  ;;  %v1367_v23 = vld [vmem:[#allocation12 + $0x74] ss:$8 sps:$4 sm:$0xff]   ;;  %v1365_v24 = vld [vmem:[#allocation12 + $0x70] ss:$8 sps:$4 sm:$0xff]  }
 0x1ec   :  { %v289_v34 = vmul.f32 %v288_v25, %v283_v26  ;;  %v290_v35 = vmul.f32 %v288_v25, %v287_v27  ;;  %v1370_v25 = vld [vmem:[#allocation12 + $0x84] ss:$8 sps:$4 sm:$0xff]   ;;  %v1368_v26 = vld [vmem:[#allocation12 + $0x80] ss:$8 sps:$4 sm:$0xff]   ;;  %v1373_v27 = vld [vmem:[#allocation12 + $0x94] ss:$8 sps:$4 sm:$0xff]  }
 0x1ee   :  { %v296_v28 = vpop.permute.xlu1 %295  ;;  %v294_v29 = vpop.permute.xlu0 %293  ;;  %v291_v45 = vadd.f32 %v289_v34, %v275_v38  ;;  %v292_v46 = vadd.f32 %v290_v35, %v276_v37  ;;  %v1380_v34 = vld [vmem:[#allocation12 + $0xc0] ss:$8 sps:$4 sm:$0xff]   ;;  %v1385_v35 = vld [vmem:[#allocation12 + $0xd4] ss:$8 sps:$4 sm:$0xff]   ;;  %v376_v37 = vlaneseq }
 0x1ef   :  { %v297_v32 = vsel %vm162_vm0, %v294_v29, %v296_v28  ;;  %v301_v33 = vsel %vm162_vm0, %v296_v28, %v294_v29  ;;  %v1371_v28 = vld [vmem:[#allocation12 + $0x90] ss:$8 sps:$4 sm:$0xff]   ;;  %v1376_v29 = vld [vmem:[#allocation12 + $0xa4] ss:$8 sps:$4 sm:$0xff]  }
 0x1f0   :  { %v303_v39 = vmul.f32 %v302_v31, %v297_v32  ;;  %v304_v40 = vmul.f32 %v302_v31, %v301_v33  ;;  %v1379_v31 = vld [vmem:[#allocation12 + $0xb4] ss:$8 sps:$4 sm:$0xff]   ;;  %v1377_v32 = vld [vmem:[#allocation12 + $0xb0] ss:$8 sps:$4 sm:$0xff]   ;;  %v1382_v33 = vld [vmem:[#allocation12 + $0xc4] ss:$8 sps:$4 sm:$0xff]  }
 0x1f1   :  { %v377_v38 = vshrl.u32 %v376_v37, 7 }
 0x1f2   :  { %v310_v41 = vpop.permute.xlu1 %309  ;;  %v308_v42 = vpop.permute.xlu0 %307  ;;  %v305_v50 = vadd.f32 %v303_v39, %v291_v45  ;;  %v306_v51 = vadd.f32 %v304_v40, %v292_v46  ;;  %v374_v40 = vld [vmem:[%s1772_s4] sm:$0x3] }
 0x1f3   :  { %v311_v43 = vsel %vm177_vm2, %v308_v42, %v310_v41  ;;  %v315_v44 = vsel %vm177_vm2, %v310_v41, %v308_v42  ;;  %v378_v39 = vsub.s32 0, %v377_v38  ;;  %v382_v41 = vsub.s32 1, %v377_v38 }
 0x1f4   :  { %v317_v47 = vmul.f32 %v316_v36, %v311_v43  ;;  %v318_v48 = vmul.f32 %v316_v36, %v315_v44  ;;  %v1383_v36 = vld [vmem:[#allocation12 + $0xd0] ss:$8 sps:$4 sm:$0xff]  }
 0x1f5   :  { %v379_v42 = vrot.slane %v374_v40, %v378_v39  ;;  %v383_v43 = vrot.slane %v374_v40, %v382_v41  ;;  %v877_v8 = vrot.slane %v872_v7, %v378_v39  ;;  %v881_v10 = vrot.slane %v872_v7, %v382_v41 }
 0x1f6   :  { %v324_v54 = vpop.permute.xlu1 %323  ;;  %v322_v55 = vpop.permute.xlu0 %321  ;;  %v319_v56 = vadd.f32 %v317_v47, %v305_v50  ;;  %v320_v57 = vadd.f32 %v318_v48, %v306_v51 }
 0x1f7   :  { %v325_v53 = vsel %vm192_vm3, %v322_v55, %v324_v54  ;;  %v329_v52 = vsel %vm192_vm3, %v324_v54, %v322_v55 }
 0x1f8   :  { %v331_v58 = vmul.f32 %v330_v49, %v325_v53  ;;  %v332_v59 = vmul.f32 %v330_v49, %v329_v52  ;;  %v1388_v53 = vld [vmem:[#allocation12 + $0xe4] ss:$8 sps:$4 sm:$0xff]   ;;  %v1386_v52 = vld [vmem:[#allocation12 + $0xe0] ss:$8 sps:$4 sm:$0xff]  }
 0x1fa   :  { %v333_v61 = vadd.f32 %v331_v58, %v319_v56  ;;  %v334_v62 = vadd.f32 %v332_v59, %v320_v57  ;;  %v1391_v56 = vld [vmem:[#allocation12 + $0xf4] ss:$8 sps:$4 sm:$0xff]   ;;  %v1389_v57 = vld [vmem:[#allocation12 + $0xf0] ss:$8 sps:$4 sm:$0xff]  }
 0x1fb   :  { %v623_v58 = vld [vmem:[%s1774_s6] sm:$0x3] }
 0x1fc   :  { %v336_v63 = vadd.f32 %v335_v60, %v333_v61  ;;  %v337_v0 = vadd.f32 %v335_v60, %v334_v62  ;;  %v628_v59 = vrot.slane %v623_v58, %v378_v39  ;;  %v632_v60 = vrot.slane %v623_v58, %v382_v41 }
 0x1fe   :  { %v338_v1 = vmax.f32 %v336_v63, 0.0  ;;  %v339_v2 = vmax.f32 %v337_v0, 0.0 }
 0x200   :  { %v341_v3 = vpack.c.bf16 %v339_v2, %v339_v2  ;;  %v340_v4 = vpack.c.bf16 %v338_v1, %v338_v1 }
 0x202   :  { %578 = vmatprep.mubr.bf16.mxu0 %v341_v3 }
 0x203   :  { %579 = vmatmul.mubr.bf16.vlgmr.msra.gmra.mrb[0].mxu0 %v340_v4 }
 0x204   :  { %1045 = vmatpush1.bf16.msra.mxu0 %v1344_v9  ;;  %v1087_v9 = vld [vmem:[%s1777_s9] sm:$0x3] }
 0x205   :  { %1046 = vmatprep.subr.bf16.mxu0 %v1349_v11 }
 0x208   :  { %1047 = vmatpush1.bf16.msra.mxu0 %v1347_v12 }
 0x209   :  { %1048 = vmatprep.subr.bf16.mxu0 %v1352_v13  ;;  %v1092_v13 = vrot.slane %v1087_v9, %v378_v39 }
 0x20c   :  { %1049 = vmatpush1.bf16.msra.mxu0 %v1350_v14 }
 0x20d   :  { %1050 = vmatprep.subr.bf16.mxu0 %v1355_v15 }
 0x210   :  { %1051 = vmatpush1.bf16.msra.mxu0 %v1353_v16  ;;  %v1096_v16 = vrot.slane %v1087_v9, %v382_v41 }
 0x211   :  { %1052 = vmatprep.subr.bf16.mxu0 %v1358_v17 }
 0x214   :  { %1053 = vmatpush1.bf16.msra.mxu0 %v1356_v18 }
 0x215   :  { %1054 = vmatprep.subr.bf16.mxu0 %v1361_v19 }
 0x218   :  { %1055 = vmatpush1.bf16.msra.mxu0 %v1359_v20 }
 0x219   :  { %1056 = vmatprep.subr.bf16.mxu0 %v1364_v21 }
 0x21c   :  { %1057 = vmatpush1.bf16.msra.mxu0 %v1362_v22 }
 0x21d   :  { %1058 = vmatprep.subr.bf16.mxu0 %v1367_v23 }
 0x220   :  { %1059 = vmatpush1.bf16.msra.mxu0 %v1365_v24  ;;  %v1235_v24 = vld [vmem:[#allocation2] ss:$0 sm:$0xff] }
 0x221   :  { %1060 = vmatprep.subr.bf16.mxu0 %v1370_v25 }
 0x224   :  { %1061 = vmatpush1.bf16.msra.mxu0 %v1368_v26 }
 0x225   :  { %1062 = vmatprep.subr.bf16.mxu0 %v1373_v27 }
 0x228   :  { %1063 = vmatpush1.bf16.msra.mxu0 %v1371_v28 }
 0x229   :  { %1064 = vmatprep.subr.bf16.mxu0 %v1376_v29 }
 0x22c   :  { %1065 = vmatpush1.bf16.msra.mxu0 %v1374_v30 }
 0x22d   :  { %1066 = vmatprep.subr.bf16.mxu0 %v1379_v31 }
 0x230   :  { %1067 = vmatpush1.bf16.msra.mxu0 %v1377_v32 }
 0x231   :  { %1068 = vmatprep.subr.bf16.mxu0 %v1382_v33 }
 0x234   :  { %1069 = vmatpush1.bf16.msra.mxu0 %v1380_v34 }
 0x235   :  { %1070 = vmatprep.subr.bf16.mxu0 %v1385_v35 }
 0x238   :  { %1071 = vmatpush1.bf16.msra.mxu0 %v1383_v36 }
 0x239   :  { %1072 = vmatprep.subr.bf16.mxu0 %v1388_v53 }
 0x23c   :  { %1073 = vmatpush1.bf16.msra.mxu0 %v1386_v52 }
 0x23d   :  { %1074 = vmatprep.subr.bf16.mxu0 %v1391_v56 }
 0x240   :  { %1075 = vmatpush1.bf16.msra.mxu0 %v1389_v57 }
 0x2d6   :  { %v580_v44 = vpop.f32.mrb[0].mxu0 }
 0x2d7   :  { %v581_v45 = vadd.f32 %v580_v44, %v379_v42  ;;  %v582_v46 = vpop.f32.mrb[1].mxu0 }
 0x2d8   :  { %v583_v47 = vadd.f32 %v582_v46, %v383_v43  ;;  %v584_v48 = vpop.f32.mrb[2].mxu0 }
 0x2d9   :  { %v587_v49 = vmax.f32 %v581_v45, 0.0  ;;  %v585_v50 = vpop.f32.mrb[3].mxu0 }
 0x2da   :  { %v588_v51 = vmax.f32 %v583_v47, 0.0 }
 0x2db   :  { %v589_v55 = vpack.c.bf16 %v587_v49, %v587_v49 }
 0x2dc   :  { %v590_v54 = vpack.c.bf16 %v588_v51, %v588_v51 }
 0x2de   :  { %827 = vmatprep.mubr.bf16.mxu1 %v590_v54 }
 0x2df   :  { %828 = vmatmul.mubr.bf16.vlgmr.msra.gmra.mrb[0].mxu1 %v589_v55 }
 0x3b2   :  { %v829_v61 = vpop.f32.mrb[0].mxu1 }
 0x3b3   :  { %v830_v62 = vadd.f32 %v829_v61, %v628_v59  ;;  %v831_v63 = vpop.f32.mrb[1].mxu1 }
 0x3b4   :  { %v832_v0 = vadd.f32 %v831_v63, %v632_v60  ;;  %v833_v1 = vpop.f32.mrb[2].mxu1 }
 0x3b5   :  { %v836_v2 = vmax.f32 %v830_v62, 0.0  ;;  %v834_v3 = vpop.f32.mrb[3].mxu1 }
 0x3b6   :  { %v837_v4 = vmax.f32 %v832_v0, 0.0 }
 0x3b7   :  { %v838_v6 = vpack.c.bf16 %v836_v2, %v836_v2 }
 0x3b8   :  { %v839_v5 = vpack.c.bf16 %v837_v4, %v837_v4 }
 0x3ba   :  { %1076 = vmatprep.mubr.bf16.mxu0 %v839_v5 }
 0x3bb   :  { %1077 = vmatmul.mubr.bf16.vlgmr.msra.gmra.mrb[4].mxu0 %v838_v6 }
 0x48e   :  { %v1078_v11 = vpop.f32.mrb[4].mxu0 }
 0x48f   :  { %v1079_v12 = vadd.f32 %v1078_v11, %v877_v8  ;;  %v1080_v14 = vpop.f32.mrb[5].mxu0 }
 0x490   :  { %v1081_v15 = vadd.f32 %v1080_v14, %v881_v10  ;;  %v1082_v17 = vpop.f32.mrb[6].mxu0 }
 0x491   :  { %v1085_v18 = vmax.f32 %v1079_v12, 0.0  ;;  %v1083_v19 = vpop.f32.mrb[7].mxu0 }
 0x492   :  { %v1086_v20 = vmax.f32 %v1081_v15, 0.0 }
 0x493   :  { %v1099_v21 = vmul.f32 %v1092_v13, %v1085_v18 }
 0x494   :  { %v1100_v22 = vmul.f32 %v1096_v16, %v1086_v20 }
 0x496   :  { %v1101_v23 = vadd.f32 %v1100_v22, %v1099_v21 }
 0x498   :  { %1102 = vadd.xlane.f32.xlu0 %v1101_v23 }
 0x525   :  { %v1103_v25 = vpop.xlane.xlu0 %1102 }
 0x526   :  { %v1111_v26 = vadd.f32 %v1235_v24, %v1103_v25 }
 0x528   :  { %1113 = vst.msk [vmem:[%s1779_s11] sm:$0xff] %vm1112_vm4, %v1111_v26 }
 0x529   :  { %1118 = vsyncpa [#allocation4], 1 }
 0x52a   :  { %1119 = vsyncpa [#allocation10], 1 }
 0x52b   :  { %1120 = vsyncpa [#allocation13], 1 }
 0x52c   :  { %1121 = vsyncpa [#allocation5], 1 }
 0x52d   :  { %1122 = vsyncpa [#allocation8], 1 }

</bundles_post_ra>
